<compile_context>
chip_gen: v7x
topology: tpu7x:2x2x1
jax: 0.10.0
libtpu: 0.0.40
codegen_flags: <defaults>
</compile_context>

<pallas_src>
import math

import jax
import jax.numpy as jnp
from jax.experimental import pallas as pl
from jax.experimental.pallas import tpu as pltpu

_LANE = 128
_MAX_COLS = 4096                 # lane-width cap (16 KiB / f32 row)
_FILL_BLOCK_BYTES = 4 << 20      # 2 output buffers -> ~8 MiB resident VMEM
_COPY_BLOCK_BYTES = 3 << 20      # 2 in + 2 out buffers -> ~12 MiB resident VMEM


def _sublane_pack(dtype):
    # 8 for 32-bit, 16 for 16-bit, 32 for 8-bit dtypes.
    return max(8, 32 // jnp.dtype(dtype).itemsize)


def _plan_lane_dense(total, dtype, target_bytes):
    """total % 128 == 0. Pick (rows, cols, tile_rows): cols a multiple of 128
    (lane-dense, unmasked stores), tile_rows a multiple of the sublane pack or
    the full row extent."""
    itemsize = jnp.dtype(dtype).itemsize
    cols = _LANE
    while cols * 2 <= _MAX_COLS and total % (cols * 2) == 0:
        cols *= 2
    rows = total // cols
    sub = _sublane_pack(dtype)
    tile_rows = max(sub, (target_bytes // (cols * itemsize)) // sub * sub)
    if tile_rows >= rows:
        tile_rows = rows  # full-extent block is always legal
    return rows, cols, tile_rows


def _plan_ragged(shape, dtype, target_bytes):
    """total % 128 != 0. Tile the original N-D shape: trailing dims full extent
    (always a legal block shape), tile only along the leading dim. Avoids any
    pad/slice HBM passes. Returns (work_shape, block_shape, grid)."""
    ndim = len(shape)
    if ndim < 2:
        # 0-D / 1-D ragged: single full-extent (1, total) block.
        # Note: a gigantic ragged 1-D array would want prefix+tail handling;
        # not needed for this module's typical shapes.
        total = math.prod(shape) if shape else 1
        work = (1, total)
        return work, work, (1,)
    itemsize = jnp.dtype(dtype).itemsize
    row_bytes = math.prod(shape[1:]) * itemsize
    tb = max(1, target_bytes // max(row_bytes, 1))
    if ndim == 2:
        # Second-to-last block dim must be a multiple of 8 or the full extent.
        tb = max(8, (tb // 8) * 8)
    if tb >= shape[0]:
        tb = shape[0]
    block = (tb,) + tuple(shape[1:])
    grid = (pl.cdiv(shape[0], tb),)
    return tuple(shape), block, grid


# ---------------------------------------------------------------------------
# Kernels
# ---------------------------------------------------------------------------

def _fill_kernel(const_ref, o_ref):
    # const_ref: (1,) float32 in SMEM. Write-only output: no input-tensor DMA.
    # astype matches torch.Tensor.fill_'s truncating cast for integer dtypes.
    val = const_ref[0].astype(o_ref.dtype)
    o_ref[...] = jnp.full(o_ref.shape, val, dtype=o_ref.dtype)


def _copy_kernel(x_ref, o_ref):
    o_ref[...] = x_ref[...]


# ---------------------------------------------------------------------------
# Wrappers
# ---------------------------------------------------------------------------

def _pallas_fill(shape, dtype, constant):
    total = math.prod(shape) if shape else 1
    if total == 0:
        return jnp.full(shape, constant, dtype=dtype)

    # Runtime scalar in SMEM: one kernel serves every constant value.
    const_arr = jnp.asarray(constant, dtype=jnp.float32).reshape((1,))
    smem_spec = pl.BlockSpec(memory_space=pltpu.MemorySpace.SMEM)
    cparams = pltpu.CompilerParams(dimension_semantics=("parallel",))

    if total % _LANE == 0:
        rows, cols, tr = _plan_lane_dense(total, dtype, _FILL_BLOCK_BYTES)
        out = pl.pallas_call(
            _fill_kernel,
            out_shape=jax.ShapeDtypeStruct((rows, cols), dtype),
            grid_spec=pltpu.PrefetchScalarGridSpec(
                num_scalar_prefetch=0,
                grid=(pl.cdiv(rows, tr),),
                in_specs=[smem_spec],
                out_specs=pl.BlockSpec((tr, cols), lambda i: (i, 0)),
            ),
            compiler_params=cparams,
        )(const_arr)
        return out.reshape(shape)

    # Ragged total: emit the exact output shape (no over-allocation, no slice).
    work_shape, block, grid = _plan_ragged(shape, dtype, _FILL_BLOCK_BYTES)
    tail = (0,) * (len(work_shape) - 1)
    out = pl.pallas_call(
        _fill_kernel,
        out_shape=jax.ShapeDtypeStruct(work_shape, dtype),
        grid_spec=pltpu.PrefetchScalarGridSpec(
            num_scalar_prefetch=0,
            grid=grid,
            in_specs=[smem_spec],
            out_specs=pl.BlockSpec(block, lambda i: (i,) + tail),
        ),
        compiler_params=cparams,
    )(const_arr)
    return out.reshape(shape)


def _pallas_copy(x):
    shape, dtype = x.shape, x.dtype
    total = math.prod(shape) if shape else 1
    if total == 0:
        return jnp.copy(x)  # still a fresh buffer for the degenerate case

    cparams = pltpu.CompilerParams(dimension_semantics=("parallel",))

    if total % _LANE == 0:
        rows, cols, tr = _plan_lane_dense(total, dtype, _COPY_BLOCK_BYTES)
        x2 = x.reshape(rows, cols)  # contiguous row-major reshape: free
        spec = pl.BlockSpec((tr, cols), lambda i: (i, 0))
        out = pl.pallas_call(
            _copy_kernel,
            out_shape=jax.ShapeDtypeStruct((rows, cols), dtype),
            grid_spec=pltpu.PrefetchScalarGridSpec(
                num_scalar_prefetch=0,
                grid=(pl.cdiv(rows, tr),),
                in_specs=[spec],
                out_specs=spec,
            ),
            compiler_params=cparams,
        )(x2)
        return out.reshape(shape)

    # Ragged total: tile the original N-D shape, no pad/slice passes.
    work_shape, block, grid = _plan_ragged(shape, dtype, _COPY_BLOCK_BYTES)
    tail = (0,) * (len(work_shape) - 1)
    spec = pl.BlockSpec(block, lambda i: (i,) + tail)
    x_nd = x.reshape(work_shape)
    out = pl.pallas_call(
        _copy_kernel,
        out_shape=jax.ShapeDtypeStruct(work_shape, dtype),
        grid_spec=pltpu.PrefetchScalarGridSpec(
            num_scalar_prefetch=0,
            grid=grid,
            in_specs=[spec],
            out_specs=spec,
        ),
        compiler_params=cparams,
    )(x_nd)
    return out.reshape(shape)


def flex_identity(x, constant_output=None, *, force_copy=False):
    """Pallas implementation of FlexIdentity.forward.

    constant_output is None -> returns x (identity, zero cost). force_copy=True
    materializes a fresh buffer via a tiled Pallas copy instead.
    constant_output is c    -> constant-filled tensor of x's shape/dtype from a
    write-only Pallas kernel (no input DMA); c may be a Python scalar or a
    traced JAX scalar (it is passed to the kernel through SMEM).
    """
    if constant_output is None:
        if force_copy:
            return _pallas_copy(x)
        return x
    return _pallas_fill(x.shape, x.dtype, constant_output)


if __name__ == "__main__":
    key = jax.random.PRNGKey(0)
    x = jax.random.normal(key, (2, 4, 16, 16), dtype=jnp.float32)

    # Case 1: constant_output is None -> identity (returns x itself).
    y_id = jax.block_until_ready(flex_identity(x, constant_output=None))
    assert y_id.shape == x.shape and y_id.dtype == x.dtype
    assert bool(jnp.all(y_id == x))

    # Case 1b: identity with an explicitly materialized copy (lane-dense path).
    y_copy = jax.block_until_ready(
        flex_identity(x, constant_output=None, force_copy=True))
    assert y_copy.shape == x.shape and y_copy.dtype == x.dtype
    assert bool(jnp.all(y_copy == x))

    # Case 2: constant fill (write-only kernel, runtime scalar through SMEM).
    y_c = jax.block_until_ready(flex_identity(x, constant_output=3.5))
    assert y_c.shape == x.shape and y_c.dtype == x.dtype
    assert bool(jnp.all(y_c == jnp.float32(3.5)))

    # Case 3: ragged element count (3*5*7=105) -> exact-shape blocks, no pad/slice.
    x_odd = jax.random.normal(jax.random.PRNGKey(1), (3, 5, 7), dtype=jnp.float32)
    y_of = jax.block_until_ready(flex_identity(x_odd, constant_output=-1.25))
    assert y_of.shape == x_odd.shape and y_of.dtype == x_odd.dtype
    assert bool(jnp.all(y_of == jnp.float32(-1.25)))
    y_oc = jax.block_until_ready(
        flex_identity(x_odd, constant_output=None, force_copy=True))
    assert bool(jnp.all(y_oc == x_odd))

    # Case 4: ragged 2-D shape.
    x2d = jax.random.normal(jax.random.PRNGKey(2), (10, 33), dtype=jnp.float32)
    y2d = jax.block_until_ready(flex_identity(x2d, constant_output=2.0))
    assert bool(jnp.all(y2d == jnp.float32(2.0)))

    # Case 5: integer dtype fill (truncating cast, matches torch fill_ semantics).
    x_int = jnp.zeros((2, 8, 32), dtype=jnp.int32)
    y_int = jax.block_until_ready(flex_identity(x_int, constant_output=7))
    assert y_int.dtype == jnp.int32 and bool(jnp.all(y_int == 7))

    # Case 6: bfloat16 fill.
    x_bf = jnp.zeros((4, 128), dtype=jnp.bfloat16)
    y_bf = jax.block_until_ready(flex_identity(x_bf, constant_output=1.5))
    assert y_bf.dtype == jnp.bfloat16 and bool(jnp.all(y_bf == jnp.bfloat16(1.5)))

    print("KERNEL_OK")
</pallas_src>

<mosaic_0001>
module attributes {stable_mosaic.version = 11 : i64} {
  func.func @_copy_kernel(%arg0: i32, %arg1: memref<1x2048xf32, #tpu.memory_space<vmem>>, %arg2: memref<1x2048xf32, #tpu.memory_space<vmem>>) attributes {dimension_semantics = [#tpu.dimension_semantics<parallel>], iteration_bounds = array<i64: 1>, scalar_prefetch = 0 : i64, scratch_operands = 0 : i64, tpu.core_type = #tpu.core_type<tc>, window_params = [{transform_indices = @transform_0, window_bounds = array<i64: 1, 2048>}, {transform_indices = @transform_1, window_bounds = array<i64: 1, 2048>}]} {
    %c0 = arith.constant 0 : index
    %c0_0 = arith.constant 0 : index
    %0 = vector.load %arg1[%c0, %c0_0] : memref<1x2048xf32, #tpu.memory_space<vmem>>, vector<1x2048xf32>
    %c0_1 = arith.constant 0 : index
    %c0_2 = arith.constant 0 : index
    %1 = vector.load %arg2[%c0_1, %c0_2] : memref<1x2048xf32, #tpu.memory_space<vmem>>, vector<1x2048xf32>
    tpu.vector_store %arg2[%c0_1, %c0_2], %0 {strides = array<i32>} : memref<1x2048xf32, #tpu.memory_space<vmem>>, vector<1x2048xf32>,
    return
  }
  func.func @transform_0(%arg0: i32) -> (i32, i32) {
    %c0_i32 = arith.constant 0 : i32
    %c0_i32_0 = arith.constant 0 : i32
    return %arg0, %c0_i32 : i32, i32
  }
  func.func @transform_1(%arg0: i32) -> (i32, i32) {
    %c0_i32 = arith.constant 0 : i32
    %c0_i32_0 = arith.constant 0 : i32
    return %arg0, %c0_i32 : i32, i32
  }
}

</mosaic_0001>

<bundles_post_ra>
// kernel: tpu_custom_call.1
= control target key start
LH: loop header
LB: loop body
LE: loop exit
PB: predicated region body
PF: predicated region fallthrough
CT: control target
= control target key end

     0   :  { %6 = vsyncpa [#allocation3], 0  ;;  %s126_s0 = inlined_call_operand.hbm [shape: f32[1,2048], index: 0, kind: input, shape index: {}]   ;;  %s127_s1 = inlined_call_operand.hbm [shape: f32[1,2048], index: 1, kind: output, shape index: {}]  }
   0x1   :  { %7 = vsyncpa [#allocation4], 0  ;;  %s90_s6 = smov [#allocation2]   ;;  %s42_s10 = scalar_lea.hbm %s126_s0, 256 }
   0x2   :  { %s14_s7 = sshll.u32 %s90_s6, 4  ;;  %p43_p0 = scmp.ne.s32.totalorder %s126_s0, %s42_s10  ;;  %s15_s7 = int_to_ptr.vmem [resolvable:$true] %s14_s7 }
   0x3   :  { %p46_p1 = scmp.lt.u32.totalorder %s42_s10, %s126_s0 }
   0x5   :  { %p48_p2 = pnand %p46_p1, %p43_p0 }
   0x7   :  { %51 = shalt.err (!%p48_p2)
}
   0x8   :  { %s52_s15 = scalar_lea.vmem %s15_s7, 256  ;;  %p57_p4 = scmp.lt.s32.totalorder %s15_s7, %s15_s7 }
   0x9   :  { %p53_p3 = scmp.ne.s32.totalorder %s15_s7, %s52_s15  ;;  %p58_p5 = scmp.lt.s32.totalorder %s52_s15, %s52_s15 }
   0xb   :  { %p59_p6 = por %p58_p5, %p57_p4 }
   0xd   :  { %p60_p7 = pnand %p59_p6, %p53_p3 }
   0xf   :  { %63 = shalt.err (!%p60_p7)
}
  0x10   :  { %17 = dma.hbm_to_vmem [thread:$0]  %s126_s0, 256, %s15_s7, [#allocation3]  }
  0x11   :  { %86 = dma.done.wait [#allocation3], 256  }
  0x12   :  { %87 = vsyncadd [#allocation3], 4294967040  ;;  %s91_s18 = smov [#allocation5]   ;;  %v21_v0 = vld [vmem:[#allocation2] sm:$0xff]  ;;  %v22_v1 = vld [vmem:[#allocation2 + $0x8] sm:$0xff] }
  0x13   :  { %s31_s19 = sshll.u32 %s91_s18, 4  ;;  %23 = vst [vmem:[#allocation5] sm:$0xff] %v21_v0  ;;  %24 = vst [vmem:[#allocation5 + $0x8] sm:$0xff] %v22_v1  ;;  %s32_s19 = int_to_ptr.vmem [resolvable:$true] %s31_s19 }
  0x14   :  { %s64_s20 = scalar_lea.vmem %s32_s19, 256  ;;  %p69_p9 = scmp.lt.s32.totalorder %s32_s19, %s32_s19 }
  0x15   :  { %p65_p8 = scmp.ne.s32.totalorder %s32_s19, %s64_s20  ;;  %p70_p10 = scmp.lt.s32.totalorder %s64_s20, %s64_s20 }
  0x17   :  { %p71_p11 = por %p70_p10, %p69_p9 }
  0x19   :  { %p72_p12 = pnand %p71_p11, %p65_p8 }
  0x1b   :  { %75 = shalt.err (!%p72_p12)
}
  0x1c   :  { %s76_s0 = scalar_lea.hbm %s127_s1, 256 }
  0x1d   :  { %p77_p13 = scmp.ne.s32.totalorder %s127_s1, %s76_s0  ;;  %p80_p0 = scmp.lt.u32.totalorder %s76_s0, %s127_s1 }
  0x1f   :  { %p82_p1 = pnand %p80_p0, %p77_p13 }
  0x21   :  { %85 = shalt.err (!%p82_p1)
}
  0x22   :  { %34 = dma.vmem_to_hbm [thread:$0]  %s32_s19, 256, %s127_s1, [#allocation4]  }
  0x23   :  { %88 = dma.done.wait [#allocation4], 256  }
  0x24   :  { %89 = vsyncadd [#allocation4], 4294967040 }
  0x25   :  { %38 = vsyncpa [#allocation3], 1 }
  0x26   :  { %39 = vsyncpa [#allocation4], 1 }

</bundles_post_ra>
